<compile_context>
chip_gen: v7x
topology: tpu7x:2x2x1
jax: 0.10.0
libtpu: 0.0.40
codegen_flags: <defaults>
</compile_context>

<pallas_src>
import functools

import jax
import jax.numpy as jnp
from jax.experimental import pallas as pl
from jax.experimental.pallas import tpu as pltpu

_LANES = 128


def _cdiv(a, b):
    return (a + b - 1) // b


def _chip_info():
    """Returns (tensorcores_to_split_over, is_v7x); conservative fallback."""
    try:
        kind = jax.devices()[0].device_kind.lower()
    except Exception:
        return 1, False
    is_v7x = ("v7" in kind) or ("7x" in kind)
    return (2 if is_v7x else 1), is_v7x


def _focal_loss_kernel(x_ref, y_ref, o_ref, *, alpha, gamma, nblk, blk_b,
                       valid_b, need_mask):
    c = pl.program_id(0)          # TensorCore split (size 1 except on v7x)
    i = pl.program_id(1)          # reduction steps for this core

    # Zero this core's accumulator block on its first reduction step.
    @pl.when(i == 0)
    def _():
        o_ref[...] = jnp.zeros_like(o_ref)

    x = x_ref[...].astype(jnp.float32)            # (blk_b, SUB, 128)
    y = y_ref[...].astype(jnp.float32)            # cast in-kernel (VPU)

    # z = x * (2y - 1); for y in {0, 1} this matches BCEWithLogits exactly.
    z = x * (y * 2.0 - 1.0)
    e = jnp.exp(-jnp.abs(z))                      # EUP
    lg = jnp.log1p(e)                             # EUP
    # BCEWithLogits(x, y) == softplus(-z) == log1p(e) - min(z, 0)
    bce = lg - jnp.minimum(z, 0.0)

    # alpha weight WITHOUT the reference's trailing *2 (folded into the mean).
    at = (2.0 * alpha - 1.0) * y + (1.0 - alpha)

    if gamma == 0.0:
        w = at
    else:
        # exp(gamma * logsigmoid(-z)) == exp(-gamma * softplus(z));
        # softplus(z) reuses lg.  One EUP exp, no divide, reference-exact.
        sp = jnp.maximum(z, 0.0) + lg
        w = at * jnp.exp(sp * (-gamma))           # EUP

    vals = w * bce                                # (blk_b, SUB, 128)

    if need_mask:
        # Ragged coverage: discard super-rows at/after the valid count.
        row = jax.lax.broadcasted_iota(jnp.int32, (blk_b, 1, 1), 0)
        lim = valid_b - (c * nblk + i) * blk_b
        vals = jnp.where(row < lim, vals, 0.0)

    # Fold only over the leading block axis (pure VPU vreg adds); the single
    # cross-lane/sublane reduce happens once outside the kernel.
    o_ref[...] += jnp.sum(vals, axis=0)[None]


def _wbce_partial_sum(x, y, alpha, gamma):
    """sum over elements of (at/2) * pt**gamma * bce  (same algebra as kernel)."""
    x = x.astype(jnp.float32)
    y = y.astype(jnp.float32)
    z = x * (y * 2.0 - 1.0)
    e = jnp.exp(-jnp.abs(z))
    lg = jnp.log1p(e)
    bce = lg - jnp.minimum(z, 0.0)
    at = (2.0 * alpha - 1.0) * y + (1.0 - alpha)
    w = at * jnp.exp((jnp.maximum(z, 0.0) + lg) * (-gamma))
    return jnp.sum(w * bce)


def focal_loss(x, y, alpha=0.25, gamma=2.0, *, max_block_elems=None):
    """Pallas TPU forward of FocalLoss(alpha, gamma): mean weighted BCE.

    x: [N] logits.  y: [N] binary {0,1} targets (any numeric dtype).
    Returns a scalar float32.  (The torch module's `w.detach()` only changes
    gradients, so this forward-only kernel matches the reference value.)
    """
    assert x.ndim == 1 and y.shape == x.shape
    n = x.shape[0]
    assert n > 0
    alpha = float(alpha)
    gamma = float(gamma)

    # Keep inputs in their native dtypes (no HBM cast pass); only fall back
    # for dtypes that don't tile nicely on TPU.
    f32, bf16, f16 = jnp.dtype(jnp.float32), jnp.dtype(jnp.bfloat16), jnp.dtype(jnp.float16)
    if x.dtype not in (f32, bf16, f16):
        x = x.astype(jnp.float32)
    if y.dtype not in (f32, bf16, f16, jnp.dtype(jnp.int32)):
        y = y.astype(jnp.float32)
    # TODO(synk): optionally ship y as int8 (respecting its (32,128) native
    # tiling) to cut HBM traffic further when targets arrive as floats.

    x_item = jnp.dtype(x.dtype).itemsize
    y_item = jnp.dtype(y.dtype).itemsize
    sub = 16 if x_item == 2 else 8            # native sublane packing of x
    chunk = sub * _LANES                      # one (SUB, 128) super-row

    b_avail = n // chunk                      # super-rows handled by the kernel
    n_main = b_avail * chunk

    # Tail (< SUB*128 elements): negligible, plain jnp.
    if n_main < n:
        tail_sum = _wbce_partial_sum(x[n_main:], y[n_main:], alpha, gamma)
    else:
        tail_sum = jnp.float32(0.0)

    if b_avail == 0:
        total = tail_sum
    else:
        ncores, is_v7x = _chip_info()

        # Bytes-based block sizing: double-buffered input blocks plus ~8 live
        # full-block f32 intermediates from the elementwise chain.
        per_elem_bytes = 2 * (x_item + y_item) + 32
        budget = (32 if is_v7x else 40) * 1024 * 1024
        tgt_elems = budget // per_elem_bytes
        if max_block_elems is not None:
            tgt_elems = min(tgt_elems, int(max_block_elems))
        tgt_b = max(1, tgt_elems // chunk)

        b_per_core = _cdiv(b_avail, ncores)
        blk_b = min(tgt_b, b_per_core)
        nblk = _cdiv(b_per_core, blk_b)
        if (ncores * nblk - 1) * blk_b >= b_avail:
            # The 2-core split would create a block starting past the array
            # (tiny inputs); drop the split so every block overlaps the data.
            ncores = 1
            blk_b = min(tgt_b, b_avail)
            nblk = _cdiv(b_avail, blk_b)
        need_mask = (ncores * nblk * blk_b != b_avail)

        # Layout-free prefix reshape (no pad, no dtype cast).
        x3 = x[:n_main].reshape(b_avail, sub, _LANES)
        y3 = y[:n_main].reshape(b_avail, sub, _LANES)

        kernel = functools.partial(
            _focal_loss_kernel, alpha=alpha, gamma=gamma, nblk=nblk,
            blk_b=blk_b, valid_b=b_avail, need_mask=need_mask)

        in_blk = pl.BlockSpec((blk_b, sub, _LANES),
                              lambda c, i: (c * nblk + i, 0, 0))
        out_blk = pl.BlockSpec((1, sub, _LANES), lambda c, i: (c, 0, 0))

        cost = pl.CostEstimate(
            flops=18 * n_main,
            transcendentals=3 * n_main,
            bytes_accessed=n_main * (x_item + y_item) + ncores * chunk * 4)

        partials = pl.pallas_call(
            kernel,
            out_shape=jax.ShapeDtypeStruct((ncores, sub, _LANES), jnp.float32),
            grid_spec=pltpu.PrefetchScalarGridSpec(
                num_scalar_prefetch=0,
                grid=(ncores, nblk),
                in_specs=[in_blk, in_blk],
                out_specs=out_blk),
            compiler_params=pltpu.CompilerParams(
                dimension_semantics=("parallel", "arbitrary"),
                vmem_limit_bytes=(48 if is_v7x else 64) * 1024 * 1024),
            cost_estimate=cost,
        )(x3, y3)

        # Single cross-lane/sublane reduction, once, on a tiny array.
        total = jnp.sum(partials) + tail_sum

    # The reference's *2 inside `at` is folded into the mean here.
    return total * (2.0 / n)


def _focal_loss_ref(x, y, alpha, gamma):
    """Direct transcription of the torch module (forward value)."""
    x = x.astype(jnp.float32)
    y = y.astype(jnp.float32)
    pt_log = jax.nn.log_sigmoid(-x * (y * 2.0 - 1.0))
    at = (alpha * y + (1.0 - alpha) * (1.0 - y)) * 2.0
    w = at * jnp.exp(pt_log * gamma)
    bce = jnp.maximum(x, 0.0) - x * y + jnp.log1p(jnp.exp(-jnp.abs(x)))
    return jnp.mean(w * bce)


if __name__ == "__main__":
    key = jax.random.PRNGKey(0)
    kx, ky = jax.random.split(key)
    alpha = 0.25

    # Small 1-D shapes, deliberately not multiples of the tile size.
    N = 2000
    x = jax.random.normal(kx, (N,), dtype=jnp.float32) * 3.0
    y = (jax.random.uniform(ky, (N,)) > 0.5).astype(jnp.float32)

    loss = jax.block_until_ready(focal_loss(x, y, alpha=alpha, gamma=2.0))
    ref = _focal_loss_ref(x, y, alpha, 2.0)
    assert jnp.allclose(loss, ref, rtol=1e-4, atol=1e-6), (loss, ref)

    # Non-integer gamma.
    loss2 = jax.block_until_ready(focal_loss(x, y, alpha=alpha, gamma=1.5))
    ref2 = _focal_loss_ref(x, y, alpha, 1.5)
    assert jnp.allclose(loss2, ref2, rtol=1e-4, atol=1e-6), (loss2, ref2)

    # Multi-block grid + in-kernel ragged mask (forced tiny blocks).
    N3 = 3500
    x3 = jax.random.normal(kx, (N3,), dtype=jnp.float32)
    y3 = (jax.random.uniform(ky, (N3,)) > 0.3).astype(jnp.float32)
    loss3 = jax.block_until_ready(
        focal_loss(x3, y3, alpha=alpha, gamma=2.0, max_block_elems=2048))
    ref3 = _focal_loss_ref(x3, y3, alpha, 2.0)
    assert jnp.allclose(loss3, ref3, rtol=1e-4, atol=1e-6), (loss3, ref3)

    # bf16 logits (SUB=16 tiling, in-kernel upcast, y stays float32).
    N4 = 2500
    x4 = (jax.random.normal(kx, (N4,), dtype=jnp.float32) * 2.0).astype(jnp.bfloat16)
    y4 = (jax.random.uniform(ky, (N4,)) > 0.5).astype(jnp.float32)
    loss4 = jax.block_until_ready(focal_loss(x4, y4, alpha=alpha, gamma=2.0))
    ref4 = _focal_loss_ref(x4, y4, alpha, 2.0)
    assert jnp.allclose(loss4, ref4, rtol=1e-3, atol=1e-5), (loss4, ref4)

    print("KERNEL_OK")
</pallas_src>

<mosaic_0001>
module attributes {stable_mosaic.version = 11 : i64} {
  func.func @_focal_loss_kernel(%arg0: i32, %arg1: i32, %arg2: memref<1x8x128xf32, #tpu.memory_space<vmem>>, %arg3: memref<1x8x128xf32, #tpu.memory_space<vmem>>, %arg4: memref<1x8x128xf32, #tpu.memory_space<vmem>>) attributes {dimension_semantics = [#tpu.dimension_semantics<parallel>, #tpu.dimension_semantics<arbitrary>], iteration_bounds = array<i64: 1, 1>, scalar_prefetch = 0 : i64, scratch_operands = 0 : i64, tpu.core_type = #tpu.core_type<tc>, window_params = [{transform_indices = @transform_0, window_bounds = array<i64: 1, 8, 128>}, {transform_indices = @transform_1, window_bounds = array<i64: 1, 8, 128>}, {transform_indices = @transform_2, window_bounds = array<i64: 1, 8, 128>}]} {
    %c0_i32 = arith.constant 0 : i32
    %0 = arith.cmpi eq, %arg1, %c0_i32 : i32
    %1 = arith.extui %0 : i1 to i32
    %c0_i32_0 = arith.constant 0 : i32
    %2 = arith.cmpi ne, %1, %c0_i32_0 : i32
    scf.if %2 {
      %cst_20 = arith.constant 0.000000e+00 : f32
      %35 = vector.broadcast %cst_20 : f32 to vector<1x8x128xf32>
      %c0_21 = arith.constant 0 : index
      %c0_22 = arith.constant 0 : index
      %c0_23 = arith.constant 0 : index
      %36 = vector.load %arg4[%c0_21, %c0_22, %c0_23] : memref<1x8x128xf32, #tpu.memory_space<vmem>>, vector<1x8x128xf32>
      tpu.vector_store %arg4[%c0_21, %c0_22, %c0_23], %35 {strides = array<i32>} : memref<1x8x128xf32, #tpu.memory_space<vmem>>, vector<1x8x128xf32>,
    } else {
    }
    %c0 = arith.constant 0 : index
    %c0_1 = arith.constant 0 : index
    %c0_2 = arith.constant 0 : index
    %3 = vector.load %arg2[%c0, %c0_1, %c0_2] : memref<1x8x128xf32, #tpu.memory_space<vmem>>, vector<1x8x128xf32>
    %c0_3 = arith.constant 0 : index
    %c0_4 = arith.constant 0 : index
    %c0_5 = arith.constant 0 : index
    %4 = vector.load %arg3[%c0_3, %c0_4, %c0_5] : memref<1x8x128xf32, #tpu.memory_space<vmem>>, vector<1x8x128xf32>
    %cst = arith.constant 2.000000e+00 : f32
    %5 = vector.broadcast %cst : f32 to vector<1x8x128xf32>
    %6 = arith.mulf %4, %5 : vector<1x8x128xf32>
    %cst_6 = arith.constant 1.000000e+00 : f32
    %7 = vector.broadcast %cst_6 : f32 to vector<1x8x128xf32>
    %8 = arith.subf %6, %7 : vector<1x8x128xf32>
    %9 = arith.mulf %3, %8 : vector<1x8x128xf32>
    %10 = math.absf %9 : vector<1x8x128xf32>
    %cst_7 = arith.constant 0.000000e+00 : f32
    %11 = vector.broadcast %cst_7 : f32 to vector<1x8x128xf32>
    %12 = arith.subf %11, %10 : vector<1x8x128xf32>
    %13 = math.exp %12 : vector<1x8x128xf32>
    %14 = math.log1p %13 : vector<1x8x128xf32>
    %cst_8 = arith.constant 0.000000e+00 : f32
    %15 = vector.broadcast %cst_8 : f32 to vector<1x8x128xf32>
    %16 = arith.minimumf %9, %15 : vector<1x8x128xf32>
    %17 = arith.subf %14, %16 : vector<1x8x128xf32>
    %cst_9 = arith.constant -5.000000e-01 : f32
    %18 = vector.broadcast %cst_9 : f32 to vector<1x8x128xf32>
    %19 = arith.mulf %18, %4 : vector<1x8x128xf32>
    %cst_10 = arith.constant 7.500000e-01 : f32
    %20 = vector.broadcast %cst_10 : f32 to vector<1x8x128xf32>
    %21 = arith.addf %19, %20 : vector<1x8x128xf32>
    %cst_11 = arith.constant 0.000000e+00 : f32
    %22 = vector.broadcast %cst_11 : f32 to vector<1x8x128xf32>
    %23 = arith.maximumf %9, %22 : vector<1x8x128xf32>
    %24 = arith.addf %23, %14 : vector<1x8x128xf32>
    %cst_12 = arith.constant -2.000000e+00 : f32
    %25 = vector.broadcast %cst_12 : f32 to vector<1x8x128xf32>
    %26 = arith.mulf %24, %25 : vector<1x8x128xf32>
    %27 = math.exp %26 : vector<1x8x128xf32>
    %28 = arith.mulf %21, %27 : vector<1x8x128xf32>
    %29 = arith.mulf %28, %17 : vector<1x8x128xf32>
    %c0_13 = arith.constant 0 : index
    %c0_14 = arith.constant 0 : index
    %c0_15 = arith.constant 0 : index
    %30 = vector.load %arg4[%c0_13, %c0_14, %c0_15] : memref<1x8x128xf32, #tpu.memory_space<vmem>>, vector<1x8x128xf32>
    %cst_16 = arith.constant dense<0.000000e+00> : vector<8x128xf32>
    %31 = vector.multi_reduction <add>, %29, %cst_16 [0] : vector<1x8x128xf32> to vector<8x128xf32>
    %32 = vector.shape_cast %31 : vector<8x128xf32> to vector<1x8x128xf32>
    %33 = arith.addf %30, %32 : vector<1x8x128xf32>
    %c0_17 = arith.constant 0 : index
    %c0_18 = arith.constant 0 : index
    %c0_19 = arith.constant 0 : index
    %34 = vector.load %arg4[%c0_17, %c0_18, %c0_19] : memref<1x8x128xf32, #tpu.memory_space<vmem>>, vector<1x8x128xf32>
    tpu.vector_store %arg4[%c0_17, %c0_18, %c0_19], %33 {strides = array<i32>} : memref<1x8x128xf32, #tpu.memory_space<vmem>>, vector<1x8x128xf32>,
    return
  }
  func.func @transform_0(%arg0: i32, %arg1: i32) -> (i32, i32, i32) {
    %c1_i32 = arith.constant 1 : i32
    %0 = arith.muli %arg0, %c1_i32 : i32
    %1 = arith.addi %0, %arg1 : i32
    %c0_i32 = arith.constant 0 : i32
    %c0_i32_0 = arith.constant 0 : i32
    %c0_i32_1 = arith.constant 0 : i32
    return %1, %c0_i32, %c0_i32_0 : i32, i32, i32
  }
  func.func @transform_1(%arg0: i32, %arg1: i32) -> (i32, i32, i32) {
    %c1_i32 = arith.constant 1 : i32
    %0 = arith.muli %arg0, %c1_i32 : i32
    %1 = arith.addi %0, %arg1 : i32
    %c0_i32 = arith.constant 0 : i32
    %c0_i32_0 = arith.constant 0 : i32
    %c0_i32_1 = arith.constant 0 : i32
    return %1, %c0_i32, %c0_i32_0 : i32, i32, i32
  }
  func.func @transform_2(%arg0: i32, %arg1: i32) -> (i32, i32, i32) {
    %c0_i32 = arith.constant 0 : i32
    %c0_i32_0 = arith.constant 0 : i32
    %c0_i32_1 = arith.constant 0 : i32
    return %arg0, %c0_i32, %c0_i32_0 : i32, i32, i32
  }
}

</mosaic_0001>

<bundles_post_ra>
// kernel: tpu_custom_call.1
= control target key start
LH: loop header
LB: loop body
LE: loop exit
PB: predicated region body
PF: predicated region fallthrough
CT: control target
= control target key end

     0   :  { %7 = vsyncpa [#allocation3], 0  ;;  %s235_s0 = inlined_call_operand.hbm [shape: f32[1,8,128], index: 0, kind: input, shape index: {}]   ;;  %s236_s1 = inlined_call_operand.hbm [shape: f32[1,8,128], index: 1, kind: input, shape index: {}]   ;;  %s237_s2 = inlined_call_operand.hbm [shape: f32[1,8,128], index: 2, kind: output, shape index: {}]  }
   0x1   :  { %8 = vsyncpa [#allocation6], 0 }
   0x2   :  { %9 = vsyncpa [#allocation4], 0  ;;  %s181_s9 = smov [#allocation2]   ;;  %s182_s11 = smov [#allocation5]  }
   0x3   :  { %s19_s10 = sshll.u32 %s181_s9, 4  ;;  %s32_s12 = sshll.u32 %s182_s11, 4  ;;  %s20_s10 = int_to_ptr.vmem [resolvable:$true] %s19_s10  ;;  %s33_s12 = int_to_ptr.vmem [resolvable:$true] %s32_s12 }
   0x4   :  { %s109_s15 = scalar_lea.hbm %s235_s0, 128 }
   0x5   :  { %p110_p0 = scmp.ne.s32.totalorder %s235_s0, %s109_s15  ;;  %p113_p1 = scmp.lt.u32.totalorder %s109_s15, %s235_s0 }
   0x7   :  { %p115_p2 = pnand %p113_p1, %p110_p0 }
   0x9   :  { %118 = shalt.err (!%p115_p2)
}
   0xa   :  { %s119_s20 = scalar_lea.vmem %s20_s10, 128  ;;  %p124_p4 = scmp.lt.s32.totalorder %s20_s10, %s20_s10 }
   0xb   :  { %p120_p3 = scmp.ne.s32.totalorder %s20_s10, %s119_s20  ;;  %p125_p5 = scmp.lt.s32.totalorder %s119_s20, %s119_s20 }
   0xd   :  { %p126_p6 = por %p125_p5, %p124_p4 }
   0xf   :  { %p127_p7 = pnand %p126_p6, %p120_p3 }
  0x11   :  { %130 = shalt.err (!%p127_p7)
}
  0x12   :  { %22 = dma.hbm_to_vmem [thread:$0]  %s235_s0, 128, %s20_s10, [#allocation3]  }
  0x13   :  { %s131_s25 = scalar_lea.hbm %s236_s1, 128 }
  0x14   :  { %p132_p8 = scmp.ne.s32.totalorder %s236_s1, %s131_s25  ;;  %p135_p9 = scmp.lt.u32.totalorder %s131_s25, %s236_s1 }
  0x16   :  { %p137_p10 = pnand %p135_p9, %p132_p8 }
  0x18   :  { %140 = shalt.err (!%p137_p10)
}
  0x19   :  { %s141_s30 = scalar_lea.vmem %s33_s12, 128  ;;  %p146_p12 = scmp.lt.s32.totalorder %s33_s12, %s33_s12 }
  0x1a   :  { %p142_p11 = scmp.ne.s32.totalorder %s33_s12, %s141_s30  ;;  %p147_p13 = scmp.lt.s32.totalorder %s141_s30, %s141_s30 }
  0x1c   :  { %p148_p0 = por %p147_p13, %p146_p12 }
  0x1e   :  { %p149_p1 = pnand %p148_p0, %p142_p11 }
  0x20   :  { %152 = shalt.err (!%p149_p1)
}
  0x21   :  { %35 = dma.hbm_to_vmem [thread:$0]  %s236_s1, 128, %s33_s12, [#allocation6]  }
  0x22   :  { %175 = dma.done.wait [#allocation3], 128  }
  0x23   :  { %176 = vsyncadd [#allocation3], 4294967168 }
  0x24   :  { %177 = dma.done.wait [#allocation6], 128  }
  0x25   :  { %178 = vsyncadd [#allocation6], 4294967168  ;;  %v50_v0 = vld [vmem:[#allocation5] sm:$0xff]  ;;  %v49_v2 = vld [vmem:[#allocation2] sm:$0xff]  ;;  %s183_s1 = smov [#allocation7]  }
  0x26   :  { %v51_v1 = vmul.f32 2.0, %v50_v0  ;;  %v69_v21 = vmul.f32 -0.5, %v50_v0  ;;  %s88_s4 = sshll.u32 %s183_s1, 4  ;;  %s89_s4 = int_to_ptr.vmem [resolvable:$true] %s88_s4 }
  0x27   :  { %s153_s5 = scalar_lea.vmem %s89_s4, 128  ;;  %p158_p3 = scmp.lt.s32.totalorder %s89_s4, %s89_s4 }
  0x28   :  { %v98_v3 = vadd.f32 -1.0, %v51_v1  ;;  %v70_v23 = vadd.f32 0.75, %v69_v21  ;;  %p154_p2 = scmp.ne.s32.totalorder %s89_s4, %s153_s5  ;;  %p159_p4 = scmp.lt.s32.totalorder %s153_s5, %s153_s5 }
  0x2a   :  { %v53_v4 = vmul.f32 %v98_v3, %v49_v2  ;;  %p160_p5 = por %p159_p4, %p158_p3 }
  0x2c   :  { %v54_v5 = vand.u32 2147483647, %v53_v4  ;;  %v71_v15 = vmax.f32 %v53_v4, 0.0  ;;  %v67_v22 = vmin.f32 %v53_v4, 0.0  ;;  %p161_p6 = pnand %p160_p5, %p154_p2 }
  0x2e   :  { %v55_v6 = vsub.f32 0.0, %v54_v5 }
  0x30   :  { %v56_v7 = vmul.f32 1.442695, %v55_v6 }
  0x32   :  { %103 = vpow2.f32 %v56_v7 }
  0x3c   :  { %v104_v8 = vpop.eup %103 }
  0x3d   :  { %v58_v9 = vadd.f32 1.0, %v104_v8  ;;  %v61_v10 = vmul.f32 -0.5, %v104_v8  ;;  %v64_v12 = vand.u32 2147483647, %v104_v8 }
  0x3f   :  { %105 = vlog2.f32 %v58_v9  ;;  %v62_v11 = vadd.f32 1.0, %v61_v10  ;;  %vm65_vm0 = vcmp.lt.f32.partialorder %v64_v12, 0.0004427343 }
  0x41   :  { %v63_v13 = vmul.f32 %v104_v8, %v62_v11 }
  0x49   :  { %v106_v14 = vpop.eup %105 }
  0x4a   :  { %v60_v16 = vmul.f32 0.6931472, %v106_v14 }
  0x4c   :  { %v66_v17 = vsel %vm65_vm0, %v63_v13, %v60_v16 }
  0x4d   :  { %v72_v18 = vadd.f32 %v71_v15, %v66_v17  ;;  %v68_v24 = vsub.f32 %v66_v17, %v67_v22 }
  0x4f   :  { %v73_v19 = vmul.f32 -2.0, %v72_v18 }
  0x51   :  { %v74_v20 = vmul.f32 1.442695, %v73_v19 }
  0x53   :  { %107 = vpow2.f32 %v74_v20 }
  0x5d   :  { %v108_v25 = vpop.eup %107 }
  0x5e   :  { %v76_v26 = vmul.f32 %v108_v25, %v70_v23 }
  0x60   :  { %v77_v27 = vmul.f32 %v76_v26, %v68_v24 }
  0x62   :  { %81 = vst [vmem:[#allocation7] sm:$0xff] %v77_v27 }
  0x63   :  { %164 = shalt.err (!%p161_p6)
}
  0x64   :  { %s165_s8 = scalar_lea.hbm %s237_s2, 128 }
  0x65   :  { %p166_p7 = scmp.ne.s32.totalorder %s237_s2, %s165_s8  ;;  %p169_p8 = scmp.lt.u32.totalorder %s165_s8, %s237_s2 }
  0x67   :  { %p171_p9 = pnand %p169_p8, %p166_p7 }
  0x69   :  { %174 = shalt.err (!%p171_p9)
}
  0x6a   :  { %91 = dma.vmem_to_hbm [thread:$0]  %s89_s4, 128, %s237_s2, [#allocation4]  }
  0x6b   :  { %179 = dma.done.wait [#allocation4], 128  }
  0x6c   :  { %180 = vsyncadd [#allocation4], 4294967168 }
  0x6d   :  { %95 = vsyncpa [#allocation3], 1 }
  0x6e   :  { %96 = vsyncpa [#allocation6], 1 }
  0x6f   :  { %97 = vsyncpa [#allocation4], 1 }

</bundles_post_ra>
